<compile_context>
chip_gen: v7x
topology: tpu7x:2x2x1
jax: 0.10.0
libtpu: 0.0.40
codegen_flags: <defaults>
</compile_context>

<pallas_src>
import jax
import jax.numpy as jnp
from jax.experimental import pallas as pl
from jax.experimental.pallas import tpu as pltpu

FC_SIZE = {'b1': 1280, 'b2': 1408, 'b3': 1536, 'b4': 1792, 'b5': 2048, 'b6': 2304, 'b7': 2560}


def _effnet_head_kernel(feat_ref, w_ref, b_ref, out_ref):
    """Fused adaptive-avg-pool(1,1) + flatten + Dropout(id) + Linear(C, 1).

    feat_ref : [B, R, 128]  lane-dense feature map (R = C*HW/128), any float dtype
    w_ref    : [1, R, 128]  f32 fc weight, replicated over HW and pre-scaled by 1/HW
    b_ref    : [1, 1]       f32 fc bias (SMEM scalar)
    out_ref  : [B, 1]       f32
    """
    # Dropout(p=0.2) is identity at inference.
    # f32 accumulation regardless of feature dtype (bf16 widens on the VPU).
    prod = feat_ref[...].astype(jnp.float32) * w_ref[...]   # [B, R, 128]  VPU
    s = jnp.sum(prod, axis=2)                                # [B, R]       XLU lane reduce
    s = jnp.sum(s, axis=1, keepdims=True)                    # [B, 1]       sublane reduce
    out_ref[...] = (s + b_ref[0, 0]).astype(out_ref.dtype)


def effnet_head(features_nchw, fc_weight, fc_bias):
    """features_nchw: [B, C, H, W] (encoder.forward_features output, NCHW like PyTorch;
                      f32 or bf16 -- consumed in its native dtype)
       fc_weight:     [1, C]  (torch nn.Linear layout [out_features, in_features])
       fc_bias:       [1]
    returns [B, 1] float32
    """
    B, C, H, W = features_nchw.shape
    HW = H * W
    CHW = C * HW
    assert CHW % 128 == 0, "C is a multiple of 128 for every EfficientNet fc size"
    R = CHW // 128

    # NCHW -> [B, R, 128]: free contiguous reshape, fully lane-dense. No dtype change.
    feats = features_nchw.reshape(B, R, 128)

    # Fold the 1/HW average-pool scale into the weight and replicate each channel's weight
    # across its HW spatial positions so it matches the lane-dense feature layout exactly.
    w = (jnp.repeat(fc_weight.reshape(C).astype(jnp.float32), HW) * (1.0 / HW)).reshape(1, R, 128)
    b = fc_bias.reshape(1, 1).astype(jnp.float32)

    cost = pl.CostEstimate(
        flops=2 * B * CHW + B,          # fused multiply + reduce, plus bias add
        transcendentals=0,
        bytes_accessed=(feats.size * feats.dtype.itemsize + w.size * 4 + b.size * 4 + B * 4),
    )

    # Single-shot: no grid, no pipeline double-buffering; whole arrays live in VMEM
    # (bias as an SMEM scalar).
    return pl.pallas_call(
        _effnet_head_kernel,
        out_shape=jax.ShapeDtypeStruct((B, 1), jnp.float32),
        in_specs=[
            pl.BlockSpec(memory_space=pltpu.MemorySpace.VMEM),
            pl.BlockSpec(memory_space=pltpu.MemorySpace.VMEM),
            pl.BlockSpec(memory_space=pltpu.MemorySpace.SMEM),
        ],
        out_specs=pl.BlockSpec(memory_space=pltpu.MemorySpace.VMEM),
        cost_estimate=cost,
    )(feats, w, b)


if __name__ == "__main__":
    arch = "b3"
    C = FC_SIZE[arch]          # 1536
    B, H, W = 2, 4, 4          # small spatial feature map

    key = jax.random.PRNGKey(0)
    k_feat, k_w, k_b = jax.random.split(key, 3)

    # Deterministic synthetic stand-in for encoder.forward_features(x) output.
    feats_nchw = jax.random.normal(k_feat, (B, C, H, W), dtype=jnp.float32)
    # Deterministic fc parameters (shapes from nn.Linear(fc_size['b3'], 1)).
    fc_weight = jax.random.normal(k_w, (1, C), dtype=jnp.float32) * 0.02
    fc_bias = jax.random.normal(k_b, (1,), dtype=jnp.float32) * 0.02

    out = effnet_head(feats_nchw, fc_weight, fc_bias)
    out = jax.block_until_ready(out)

    # Pure-JAX reference of the same head (pool -> flatten -> (dropout id) -> fc).
    ref = jnp.mean(feats_nchw, axis=(2, 3)) @ fc_weight.T + fc_bias
    assert out.shape == (B, 1)
    assert jnp.allclose(out, ref, atol=1e-4, rtol=1e-4), (out, ref)

    print("KERNEL_OK")
</pallas_src>

<mosaic_0001>
module attributes {stable_mosaic.version = 11 : i64} {
  func.func @_effnet_head_kernel(%arg0: memref<2x192x128xf32, #tpu.memory_space<vmem>>, %arg1: memref<1x192x128xf32, #tpu.memory_space<vmem>>, %arg2: memref<1x1xf32, #tpu.memory_space<smem>>, %arg3: memref<2x1xf32, #tpu.memory_space<vmem>>) attributes {dimension_semantics = [], scalar_prefetch = 0 : i64, scratch_operands = 0 : i64, tpu.core_type = #tpu.core_type<tc>} {
    %c0 = arith.constant 0 : index
    %c0_0 = arith.constant 0 : index
    %c0_1 = arith.constant 0 : index
    %0 = vector.load %arg0[%c0, %c0_0, %c0_1] : memref<2x192x128xf32, #tpu.memory_space<vmem>>, vector<2x192x128xf32>
    %c0_2 = arith.constant 0 : index
    %c0_3 = arith.constant 0 : index
    %c0_4 = arith.constant 0 : index
    %1 = vector.load %arg1[%c0_2, %c0_3, %c0_4] : memref<1x192x128xf32, #tpu.memory_space<vmem>>, vector<1x192x128xf32>
    %2 = vector.broadcast %1 : vector<1x192x128xf32> to vector<2x192x128xf32>
    %3 = arith.mulf %0, %2 : vector<2x192x128xf32>
    %cst = arith.constant dense<0.000000e+00> : vector<2x192xf32>
    %4 = vector.multi_reduction <add>, %3, %cst [2] : vector<2x192x128xf32> to vector<2x192xf32>
    %cst_5 = arith.constant dense<0.000000e+00> : vector<2xf32>
    %5 = vector.multi_reduction <add>, %4, %cst_5 [1] : vector<2x192xf32> to vector<2xf32>
    %6 = vector.shape_cast %5 : vector<2xf32> to vector<2x1xf32>
    %c0_6 = arith.constant 0 : index
    %c0_7 = arith.constant 0 : index
    %7 = memref.load %arg2[%c0_6, %c0_7] : memref<1x1xf32, #tpu.memory_space<smem>>
    %8 = vector.broadcast %7 : f32 to vector<2x1xf32>
    %9 = arith.addf %6, %8 : vector<2x1xf32>
    %c0_8 = arith.constant 0 : index
    %c0_9 = arith.constant 0 : index
    %10 = vector.load %arg3[%c0_8, %c0_9] : memref<2x1xf32, #tpu.memory_space<vmem>>, vector<2x1xf32>
    tpu.vector_store %arg3[%c0_8, %c0_9], %9 {strides = array<i32>} : memref<2x1xf32, #tpu.memory_space<vmem>>, vector<2x1xf32>,
    return
  }
}

</mosaic_0001>

<bundles_post_ra>
// kernel: tpu_custom_call.1
= control target key start
LH: loop header
LB: loop body
LE: loop exit
PB: predicated region body
PF: predicated region fallthrough
CT: control target
= control target key end

     0   :  { %9 = vsyncpa [#allocation4], 0  ;;  %s950_s0 = inlined_call_operand.hbm [shape: f32[2,192,128], index: 0, kind: input, shape index: {}]   ;;  %s951_s1 = inlined_call_operand.hbm [shape: f32[1,192,128], index: 1, kind: input, shape index: {}]   ;;  %s952_s2 = inlined_call_operand.<no memory space> [shape: f32[1,1], index: 2, kind: input, shape index: {}]   ;;  %s953_s3 = inlined_call_operand.vmem [shape: f32[2,1], index: 3, kind: output, shape index: {}]  }
   0x1   :  { %10 = vsyncpa [#allocation6], 0  ;;  %s650_s12 = smov [#allocation3]   ;;  %s602_s16 = scalar_lea.hbm %s950_s0, 6144 }
   0x2   :  { %s16_s13 = sshll.u32 %s650_s12, 4  ;;  %p603_p0 = scmp.ne.s32.totalorder %s950_s0, %s602_s16  ;;  %s17_s13 = int_to_ptr.vmem [resolvable:$true] %s16_s13 }
   0x3   :  { %p606_p1 = scmp.lt.u32.totalorder %s602_s16, %s950_s0 }
   0x5   :  { %p608_p2 = pnand %p606_p1, %p603_p0 }
   0x7   :  { %611 = shalt.err (!%p608_p2)
}
   0x8   :  { %s612_s21 = scalar_lea.vmem %s17_s13, 6144  ;;  %p617_p4 = scmp.lt.s32.totalorder %s17_s13, %s17_s13 }
   0x9   :  { %p613_p3 = scmp.ne.s32.totalorder %s17_s13, %s612_s21  ;;  %p618_p5 = scmp.lt.s32.totalorder %s612_s21, %s612_s21 }
   0xb   :  { %p619_p6 = por %p618_p5, %p617_p4 }
   0xd   :  { %p620_p7 = pnand %p619_p6, %p613_p3 }
   0xf   :  { %623 = shalt.err (!%p620_p7)
}
  0x10   :  { %s651_s22 = smov 128   ;;  %s652_s23 = smov 8  }
  0x11   :  { %22 = dma.hbm_to_vmem [thread:$0]  %s950_s0, 6144, %s17_s13, [#allocation4], %s651_s22, %s651_s22, %s652_s23  }
  0x12   :  { %s653_s26 = smov [#allocation5]   ;;  %s624_s30 = scalar_lea.hbm %s951_s1, 3072 }
  0x13   :  { %s28_s27 = sshll.u32 %s653_s26, 4  ;;  %p625_p8 = scmp.ne.s32.totalorder %s951_s1, %s624_s30  ;;  %s29_s27 = int_to_ptr.vmem [resolvable:$true] %s28_s27 }
  0x14   :  { %p628_p9 = scmp.lt.u32.totalorder %s624_s30, %s951_s1 }
  0x16   :  { %p630_p10 = pnand %p628_p9, %p625_p8 }
  0x18   :  { %633 = shalt.err (!%p630_p10)
}
  0x19   :  { %s634_s8 = scalar_lea.vmem %s29_s27, 3072  ;;  %p639_p12 = scmp.lt.s32.totalorder %s29_s27, %s29_s27 }
  0x1a   :  { %p635_p11 = scmp.ne.s32.totalorder %s29_s27, %s634_s8  ;;  %p640_p13 = scmp.lt.s32.totalorder %s634_s8, %s634_s8 }
  0x1c   :  { %p641_p0 = por %p640_p13, %p639_p12 }
  0x1e   :  { %p642_p1 = pnand %p641_p0, %p635_p11 }
  0x20   :  { %645 = shalt.err (!%p642_p1)
}
  0x21   :  { %34 = dma.hbm_to_vmem [thread:$0]  %s951_s1, 3072, %s29_s27, [#allocation6], %s651_s22, %s651_s22, %s652_s23  }
  0x22   :  { %646 = dma.done.wait [#allocation4], 6144  }
  0x23   :  { %647 = vsyncadd [#allocation4], 4294961152 }
  0x24   :  { %648 = dma.done.wait [#allocation6], 3072  }
  0x25   :  { %649 = vsyncadd [#allocation6], 4294964224  ;;  %v67_v0 = vld [vmem:[#allocation3 + $0xc0] sm:$0xff]  ;;  %v68_v5 = vld [vmem:[#allocation3 + $0xc8] sm:$0xff]  ;;  %vm318_vm0 = vcmask 130112   ;;  %vm325_vm1 = vcmask 195712  }
  0x26   :  { %v91_v1 = vld [vmem:[#allocation5] sm:$0xff]  ;;  %v92_v6 = vld [vmem:[#allocation5 + $0x8] sm:$0xff]  ;;  %v69_v10 = vld [vmem:[#allocation3 + $0xd0] sm:$0xff]  ;;  %vm332_vm2 = vcmask 261312   ;;  %vm339_vm3 = vcmask 326912   ;;  %vm346_vm4 = vcmask 392512  }
  0x27   :  { %v43_v2 = vld [vmem:[#allocation3] sm:$0xff]  ;;  %v139_v3 = vmul.f32 %v91_v1, %v67_v0  ;;  %v44_v7 = vld [vmem:[#allocation3 + $0x8] sm:$0xff]  ;;  %v140_v8 = vmul.f32 %v92_v6, %v68_v5  ;;  %v93_v11 = vld [vmem:[#allocation5 + $0x10] sm:$0xff]  ;;  %vm353_vm5 = vcmask 458112   ;;  %vm360_vm6 = vcmask 523712  }
  0x28   :  { %v115_v4 = vmul.f32 %v91_v1, %v43_v2  ;;  %v116_v9 = vmul.f32 %v92_v6, %v44_v7  ;;  %v45_v12 = vld [vmem:[#allocation3 + $0x10] sm:$0xff]  ;;  %v141_v13 = vmul.f32 %v93_v11, %v69_v10  ;;  %v70_v15 = vld [vmem:[#allocation3 + $0xd8] sm:$0xff]  ;;  %v71_v20 = vld [vmem:[#allocation3 + $0xe0] sm:$0xff]  ;;  %vm367_vm7 = vcmask 589312  }
  0x29   :  { %211 = vadd.xlane.f32.xlu1 %v139_v3  ;;  %v117_v14 = vmul.f32 %v93_v11, %v45_v12  ;;  %v94_v16 = vld [vmem:[#allocation5 + $0x18] sm:$0xff]  ;;  %v95_v21 = vld [vmem:[#allocation5 + $0x20] sm:$0xff]  ;;  %v72_v25 = vld [vmem:[#allocation3 + $0xe8] sm:$0xff]  ;;  %vm374_vm8 = vcmask 654912   ;;  %vm381_vm9 = vcmask 720512   ;;  %vm388_vm10 = vcmask 786112  }
  0x2a   :  { %163 = vadd.xlane.f32.xlu0 %v115_v4  ;;  %v46_v17 = vld [vmem:[#allocation3 + $0x18] sm:$0xff]  ;;  %v142_v18 = vmul.f32 %v94_v16, %v70_v15  ;;  %v47_v22 = vld [vmem:[#allocation3 + $0x20] sm:$0xff]  ;;  %v143_v23 = vmul.f32 %v95_v21, %v71_v20  ;;  %v96_v26 = vld [vmem:[#allocation5 + $0x28] sm:$0xff]  ;;  %vm395_vm11 = vcmask 851712   ;;  %vm402_vm12 = vcmask 917312  }
  0x2b   :  { %v118_v19 = vmul.f32 %v94_v16, %v46_v17  ;;  %v119_v24 = vmul.f32 %v95_v21, %v47_v22  ;;  %v48_v27 = vld [vmem:[#allocation3 + $0x28] sm:$0xff]  ;;  %v144_v28 = vmul.f32 %v96_v26, %v72_v25  ;;  %v73_v30 = vld [vmem:[#allocation3 + $0xf0] sm:$0xff]  ;;  %v74_v35 = vld [vmem:[#allocation3 + $0xf8] sm:$0xff]  ;;  %vm409_vm13 = vcmask 982912  }
  0x2c   :  { %v120_v29 = vmul.f32 %v96_v26, %v48_v27  ;;  %v97_v31 = vld [vmem:[#allocation5 + $0x30] sm:$0xff]  ;;  %v98_v36 = vld [vmem:[#allocation5 + $0x38] sm:$0xff]  ;;  %v75_v40 = vld [vmem:[#allocation3 + $0x100] sm:$0xff]  ;;  %vm416_vm14 = vcmask 1048512   ;;  %vm575_vm15 = vcmask 1041409  }
  0x2d   :  { %213 = vadd.xlane.f32.xlu1 %v140_v8  ;;  %v49_v32 = vld [vmem:[#allocation3 + $0x30] sm:$0xff]  ;;  %v145_v33 = vmul.f32 %v97_v31, %v73_v30  ;;  %v50_v37 = vld [vmem:[#allocation3 + $0x38] sm:$0xff]  ;;  %v146_v38 = vmul.f32 %v98_v36, %v74_v35  ;;  %v99_v41 = vld [vmem:[#allocation5 + $0x40] sm:$0xff] }
  0x2e   :  { %165 = vadd.xlane.f32.xlu0 %v116_v9  ;;  %v121_v34 = vmul.f32 %v97_v31, %v49_v32  ;;  %v122_v39 = vmul.f32 %v98_v36, %v50_v37  ;;  %v51_v42 = vld [vmem:[#allocation3 + $0x40] sm:$0xff]  ;;  %v147_v43 = vmul.f32 %v99_v41, %v75_v40  ;;  %v52_v47 = vld [vmem:[#allocation3 + $0x48] sm:$0xff]  ;;  %v61_v60 = vld [vmem:[#allocation3 + $0x90] sm:$0xff] }
  0x2f   :  { %v123_v44 = vmul.f32 %v99_v41, %v51_v42  ;;  %v59_v45 = vld [vmem:[#allocation3 + $0x80] sm:$0xff]  ;;  %v100_v48 = vld [vmem:[#allocation5 + $0x48] sm:$0xff]  ;;  %v109_v61 = vld [vmem:[#allocation5 + $0x90] sm:$0xff] }
  0x30   :  { %v107_v46 = vld [vmem:[#allocation5 + $0x80] sm:$0xff]  ;;  %v124_v50 = vmul.f32 %v100_v48, %v52_v47  ;;  %v76_v51 = vld [vmem:[#allocation3 + $0x108] sm:$0xff]  ;;  %v53_v62 = vld [vmem:[#allocation3 + $0x50] sm:$0xff]  ;;  %v133_v0 = vmul.f32 %v109_v61, %v61_v60 }
  0x31   :  { %215 = vadd.xlane.f32.xlu1 %v141_v13  ;;  %v131_v49 = vmul.f32 %v107_v46, %v59_v45  ;;  %v60_v52 = vld [vmem:[#allocation3 + $0x88] sm:$0xff]  ;;  %v148_v54 = vmul.f32 %v100_v48, %v76_v51  ;;  %v83_v57 = vld [vmem:[#allocation3 + $0x140] sm:$0xff]  ;;  %v101_v63 = vld [vmem:[#allocation5 + $0x50] sm:$0xff] }
  0x32   :  { %167 = vadd.xlane.f32.xlu0 %v117_v14  ;;  %v108_v53 = vld [vmem:[#allocation5 + $0x88] sm:$0xff]  ;;  %v155_v59 = vmul.f32 %v107_v46, %v83_v57  ;;  %v125_v1 = vmul.f32 %v101_v63, %v53_v62  ;;  %v85_v2 = vld [vmem:[#allocation3 + $0x150] sm:$0xff]  ;;  %v62_v6 = vld [vmem:[#allocation3 + $0x98] sm:$0xff] }
  0x33   :  { %v132_v55 = vmul.f32 %v108_v53, %v60_v52  ;;  %v84_v56 = vld [vmem:[#allocation3 + $0x148] sm:$0xff]  ;;  %v77_v3 = vld [vmem:[#allocation3 + $0x110] sm:$0xff]  ;;  %v157_v4 = vmul.f32 %v109_v61, %v85_v2  ;;  %v110_v7 = vld [vmem:[#allocation5 + $0x98] sm:$0xff] }
  0x34   :  { %v156_v58 = vmul.f32 %v108_v53, %v84_v56  ;;  %v149_v5 = vmul.f32 %v101_v63, %v77_v3  ;;  %v54_v8 = vld [vmem:[#allocation3 + $0x58] sm:$0xff]  ;;  %v134_v10 = vmul.f32 %v110_v7, %v62_v6  ;;  %v63_v16 = vld [vmem:[#allocation3 + $0xa0] sm:$0xff]  ;;  %v64_v26 = vld [vmem:[#allocation3 + $0xa8] sm:$0xff]  ;;  %v307_v56 = vlaneseq }
  0x35   :  { %217 = vadd.xlane.f32.xlu1 %v142_v18  ;;  %v102_v9 = vld [vmem:[#allocation5 + $0x58] sm:$0xff]  ;;  %v111_v17 = vld [vmem:[#allocation5 + $0xa0] sm:$0xff]  ;;  %v112_v27 = vld [vmem:[#allocation5 + $0xa8] sm:$0xff] }
  0x36   :  { %169 = vadd.xlane.f32.xlu0 %v118_v19  ;;  %v126_v11 = vmul.f32 %v102_v9, %v54_v8  ;;  %v86_v12 = vld [vmem:[#allocation3 + $0x158] sm:$0xff]  ;;  %v55_v18 = vld [vmem:[#allocation3 + $0x60] sm:$0xff]  ;;  %v135_v20 = vmul.f32 %v111_v17, %v63_v16  ;;  %v136_v30 = vmul.f32 %v112_v27, %v64_v26  ;;  %v88_v32 = vld [vmem:[#allocation3 + $0x168] sm:$0xff]  ;;  %v698_v57 = vand.u32 127, %v307_v56 }
  0x37   :  { %v78_v13 = vld [vmem:[#allocation3 + $0x118] sm:$0xff]  ;;  %v158_v14 = vmul.f32 %v110_v7, %v86_v12  ;;  %v103_v19 = vld [vmem:[#allocation5 + $0x60] sm:$0xff]  ;;  %v65_v36 = vld [vmem:[#allocation3 + $0xb0] sm:$0xff] }
  0x38   :  { %v150_v15 = vmul.f32 %v102_v9, %v78_v13  ;;  %v127_v21 = vmul.f32 %v103_v19, %v55_v18  ;;  %v87_v22 = vld [vmem:[#allocation3 + $0x160] sm:$0xff]  ;;  %v113_v37 = vld [vmem:[#allocation5 + $0xb0] sm:$0xff]  ;;  %v66_v46 = vld [vmem:[#allocation3 + $0xb8] sm:$0xff]  ;;  %v320_v62 = vadd.s32 4294967280, %v698_v57  ;;  %v334_v16 = vadd.s32 4294967264, %v698_v57 }
  0x39   :  { %219 = vadd.xlane.f32.xlu1 %v143_v23  ;;  %v79_v23 = vld [vmem:[#allocation3 + $0x120] sm:$0xff]  ;;  %v137_v40 = vmul.f32 %v113_v37, %v65_v36  ;;  %v89_v42 = vld [vmem:[#allocation3 + $0x170] sm:$0xff]  ;;  %v114_v47 = vld [vmem:[#allocation5 + $0xb8] sm:$0xff] }
  0x3a   :  { %171 = vadd.xlane.f32.xlu0 %v119_v24  ;;  %v159_v24 = vmul.f32 %v111_v17, %v87_v22  ;;  %v151_v25 = vmul.f32 %v103_v19, %v79_v23  ;;  %v58_v48 = vld [vmem:[#allocation3 + $0x78] sm:$0xff] }
  0x3b   :  { %v90_v52 = vld [vmem:[#allocation3 + $0x178] sm:$0xff] }
  0x3c   :  { %v82_v53 = vld [vmem:[#allocation3 + $0x138] sm:$0xff] }
  0x3d   :  { %221 = vadd.xlane.f32.xlu1 %v144_v28  ;;  %v56_v28 = vld [vmem:[#allocation3 + $0x68] sm:$0xff] }
  0x3e   :  { %173 = vadd.xlane.f32.xlu0 %v120_v29  ;;  %v104_v29 = vld [vmem:[#allocation5 + $0x68] sm:$0xff] }
  0x3f   :  { %v128_v31 = vmul.f32 %v104_v29, %v56_v28 }
  0x41   :  { %223 = vadd.xlane.f32.xlu1 %v145_v33  ;;  %v80_v33 = vld [vmem:[#allocation3 + $0x128] sm:$0xff] }
  0x42   :  { %175 = vadd.xlane.f32.xlu0 %v121_v34  ;;  %v160_v34 = vmul.f32 %v112_v27, %v88_v32  ;;  %v152_v35 = vmul.f32 %v104_v29, %v80_v33 }
  0x45   :  { %225 = vadd.xlane.f32.xlu1 %v146_v38  ;;  %v57_v38 = vld [vmem:[#allocation3 + $0x70] sm:$0xff] }
  0x46   :  { %177 = vadd.xlane.f32.xlu0 %v122_v39  ;;  %v105_v39 = vld [vmem:[#allocation5 + $0x70] sm:$0xff] }
  0x47   :  { %v129_v41 = vmul.f32 %v105_v39, %v57_v38 }
  0x49   :  { %227 = vadd.xlane.f32.xlu1 %v147_v43  ;;  %v81_v43 = vld [vmem:[#allocation3 + $0x130] sm:$0xff] }
  0x4a   :  { %179 = vadd.xlane.f32.xlu0 %v123_v44  ;;  %v161_v44 = vmul.f32 %v113_v37, %v89_v42  ;;  %v153_v45 = vmul.f32 %v105_v39, %v81_v43 }
  0x4d   :  { %195 = vadd.xlane.f32.xlu1 %v131_v49  ;;  %v106_v49 = vld [vmem:[#allocation5 + $0x78] sm:$0xff] }
  0x4e   :  { %181 = vadd.xlane.f32.xlu0 %v124_v50  ;;  %v138_v50 = vmul.f32 %v114_v47, %v66_v46  ;;  %v130_v51 = vmul.f32 %v106_v49, %v58_v48 }
  0x51   :  { %229 = vadd.xlane.f32.xlu1 %v148_v54  ;;  %v162_v54 = vmul.f32 %v114_v47, %v90_v52 }
  0x52   :  { %197 = vadd.xlane.f32.xlu0 %v132_v55  ;;  %v154_v55 = vmul.f32 %v106_v49, %v82_v53 }
  0x55   :  { %245 = vadd.xlane.f32.xlu1 %v156_v58  ;;  %v700_v58 = vshrl.u32 %v307_v56, 7  ;;  %v341_v56 = vadd.s32 4294967256, %v698_v57 }
  0x56   :  { %243 = vadd.xlane.f32.xlu0 %v155_v59  ;;  %v313_v59 = vadd.s32 4294967288, %v698_v57 }
  0x57   :  { %v706_v63 = vsub.s32 %v698_v57, %v700_v58  ;;  %v712_v3 = vsub.s32 %v320_v62, %v700_v58  ;;  %v732_v23 = vsub.s32 %v334_v16, %v700_v58  ;;  %v397_v16 = vadd.s32 4294967192, %v698_v57 }
  0x59   :  { %199 = vadd.xlane.f32.xlu1 %v133_v0  ;;  %v709_v0 = vsub.s32 %v313_v59, %v700_v58  ;;  %v348_v59 = vadd.s32 4294967248, %v698_v57 }
  0x5a   :  { %183 = vadd.xlane.f32.xlu0 %v125_v1 }
  0x5d   :  { %247 = vadd.xlane.f32.xlu1 %v157_v4  ;;  %v327_v4 = vadd.s32 4294967272, %v698_v57 }
  0x5e   :  { %231 = vadd.xlane.f32.xlu0 %v149_v5 }
  0x61   :  { %201 = vadd.xlane.f32.xlu1 %v134_v10 }
  0x62   :  { %185 = vadd.xlane.f32.xlu0 %v126_v11 }
  0x65   :  { %249 = vadd.xlane.f32.xlu1 %v158_v14 }
  0x66   :  { %233 = vadd.xlane.f32.xlu0 %v150_v15  ;;  %v724_v15 = vsub.s32 %v327_v4, %v700_v58  ;;  %v804_v4 = vsub.s32 %v348_v59, %v700_v58 }
  0x69   :  { %203 = vadd.xlane.f32.xlu1 %v135_v20 }
  0x6a   :  { %187 = vadd.xlane.f32.xlu0 %v127_v21 }
  0x6d   :  { %251 = vadd.xlane.f32.xlu1 %v159_v24 }
  0x6e   :  { %235 = vadd.xlane.f32.xlu0 %v151_v25 }
  0x71   :  { %205 = vadd.xlane.f32.xlu1 %v136_v30 }
  0x72   :  { %189 = vadd.xlane.f32.xlu0 %v128_v31 }
  0x75   :  { %253 = vadd.xlane.f32.xlu1 %v160_v34 }
  0x76   :  { %237 = vadd.xlane.f32.xlu0 %v152_v35 }
  0x79   :  { %207 = vadd.xlane.f32.xlu1 %v137_v40 }
  0x7a   :  { %191 = vadd.xlane.f32.xlu0 %v129_v41 }
  0x7d   :  { %255 = vadd.xlane.f32.xlu1 %v161_v44 }
  0x7e   :  { %239 = vadd.xlane.f32.xlu0 %v153_v45 }
  0x81   :  { %209 = vadd.xlane.f32.xlu1 %v138_v50 }
  0x82   :  { %193 = vadd.xlane.f32.xlu0 %v130_v51 }
  0x85   :  { %257 = vadd.xlane.f32.xlu1 %v162_v54 }
  0x86   :  { %241 = vadd.xlane.f32.xlu0 %v154_v55 }
  0xb6   :  { %v212_v60 = vpop.xlane.xlu1 %211 }
  0xb7   :  { %v164_v61 = vpop.xlane.xlu0 %163  ;;  %v460_v5 = vrot.slane %v212_v60, %v706_v63  ;;  %v355_v60 = vadd.s32 4294967240, %v698_v57 }
  0xb8   :  { %v312_v6 = vrot.slane %v164_v61, %v706_v63 }
  0xba   :  { %v214_v1 = vpop.xlane.xlu1 %213 }
  0xbb   :  { %v166_v2 = vpop.xlane.xlu0 %165  ;;  %v464_v7 = vrot.slane %v214_v1, %v709_v0  ;;  %v362_v1 = vadd.s32 4294967232, %v698_v57 }
  0xbc   :  { %v317_v8 = vrot.slane %v166_v2, %v709_v0  ;;  %v801_v2 = vsub.s32 %v341_v56, %v700_v58  ;;  %v411_v56 = vadd.s32 4294967176, %v698_v57 }
  0xbd   :  { %v465_v9 = vsel %vm318_vm0, %v464_v7, %v460_v5  ;;  %v369_v5 = vadd.s32 4294967224, %v698_v57  ;;  %v376_v7 = vadd.s32 4294967216, %v698_v57 }
  0xbe   :  { %v319_v10 = vsel %vm318_vm0, %v317_v8, %v312_v6  ;;  %v216_v11 = vpop.xlane.xlu1 %215  ;;  %v808_v6 = vsub.s32 %v355_v60, %v700_v58 }
  0xbf   :  { %v168_v12 = vpop.xlane.xlu0 %167  ;;  %v469_v13 = vrot.slane %v216_v11, %v712_v3  ;;  %v383_v11 = vadd.s32 4294967208, %v698_v57 }
  0xc0   :  { %v324_v14 = vrot.slane %v168_v12, %v712_v3  ;;  %v390_v12 = vadd.s32 4294967200, %v698_v57 }
  0xc1   :  { %v470_v17 = vsel %vm325_vm1, %v469_v13, %v465_v9 }
  0xc2   :  { %v326_v18 = vsel %vm325_vm1, %v324_v14, %v319_v10  ;;  %v218_v19 = vpop.xlane.xlu1 %217  ;;  %v365_v10 = vsub.s32 %v362_v1, %v700_v58 }
  0xc3   :  { %v170_v20 = vpop.xlane.xlu0 %169  ;;  %v474_v21 = vrot.slane %v218_v19, %v724_v15 }
  0xc4   :  { %v331_v22 = vrot.slane %v170_v20, %v724_v15  ;;  %v372_v20 = vsub.s32 %v369_v5, %v700_v58 }
  0xc5   :  { %v475_v24 = vsel %vm332_vm2, %v474_v21, %v470_v17  ;;  %v404_v17 = vadd.s32 4294967184, %v698_v57 }
  0xc6   :  { %v333_v25 = vsel %vm332_vm2, %v331_v22, %v326_v18  ;;  %v220_v26 = vpop.xlane.xlu1 %219 }
  0xc7   :  { %v172_v27 = vpop.xlane.xlu0 %171  ;;  %v479_v28 = vrot.slane %v220_v26, %v732_v23 }
  0xc8   :  { %v338_v29 = vrot.slane %v172_v27, %v732_v23 }
  0xc9   :  { %v739_v30 = vsel %vm339_vm3, %v479_v28, %v475_v24  ;;  %v379_v24 = vsub.s32 %v376_v7, %v700_v58  ;;  %v386_v28 = vsub.s32 %v383_v11, %v700_v58 }
  0xca   :  { %v742_v31 = vsel %vm339_vm3, %v338_v29, %v333_v25  ;;  %v744_v32 = vpop.xlane.xlu1 %221  ;;  %v841_v29 = vsub.s32 %v390_v12, %v700_v58 }
  0xcb   :  { %v746_v33 = vpop.xlane.xlu0 %173  ;;  %v484_v13 = vrot.slane %v744_v32, %v801_v2 }
  0xcc   :  { %v345_v14 = vrot.slane %v746_v33, %v801_v2 }
  0xcd   :  { %v485_v32 = vsel %vm346_vm4, %v484_v13, %v739_v30 }
  0xce   :  { %v748_v34 = vpop.xlane.xlu1 %223  ;;  %v347_v33 = vsel %vm346_vm4, %v345_v14, %v742_v31 }
  0xcf   :  { %v750_v35 = vpop.xlane.xlu0 %175  ;;  %v489_v18 = vrot.slane %v748_v34, %v804_v4  ;;  %v848_v34 = vsub.s32 %v397_v16, %v700_v58 }
  0xd0   :  { %v352_v19 = vrot.slane %v750_v35, %v804_v4  ;;  %v851_v35 = vsub.s32 %v404_v17, %v700_v58 }
  0xd2   :  { %v752_v36 = vpop.xlane.xlu1 %225 }
  0xd3   :  { %v754_v37 = vpop.xlane.xlu0 %177  ;;  %v494_v21 = vrot.slane %v752_v36, %v808_v6  ;;  %v490_v36 = vsel %vm353_vm5, %v489_v18, %v485_v32 }
  0xd4   :  { %v359_v22 = vrot.slane %v754_v37, %v808_v6  ;;  %v354_v37 = vsel %vm353_vm5, %v352_v19, %v347_v33 }
  0xd5   :  { %v495_v59 = vsel %vm360_vm6, %v494_v21, %v490_v36 }
  0xd6   :  { %v756_v38 = vpop.xlane.xlu1 %227  ;;  %v361_v30 = vsel %vm360_vm6, %v359_v22, %v354_v37 }
  0xd7   :  { %v758_v39 = vpop.xlane.xlu0 %179  ;;  %v499_v27 = vrot.slane %v756_v38, %v365_v10 }
  0xd8   :  { %v366_v38 = vrot.slane %v758_v39, %v365_v10 }
  0xd9   :  { %v500_v7 = vsel %vm367_vm7, %v499_v27, %v495_v59 }
  0xda   :  { %v760_v40 = vpop.xlane.xlu1 %195  ;;  %v368_v13 = vsel %vm367_vm7, %v366_v38, %v361_v30  ;;  %vm580_vm7 = vcmask 1041408  }
  0xdb   :  { %v762_v41 = vpop.xlane.xlu0 %181 }
  0xdc   :  { %v373_v31 = vrot.slane %v762_v41, %v372_v20 }
  0xde   :  { %v764_v42 = vpop.xlane.xlu1 %229 }
  0xdf   :  { %v766_v43 = vpop.xlane.xlu0 %197  ;;  %v504_v60 = vrot.slane %v764_v42, %v372_v20 }
  0xe0   :  { %v425_v39 = vrot.slane %v766_v43, %v709_v0  ;;  %v421_v43 = vrot.slane %v760_v40, %v706_v63 }
  0xe2   :  { %v768_v44 = vpop.xlane.xlu1 %245 }
  0xe3   :  { %v770_v45 = vpop.xlane.xlu0 %243  ;;  %v543_v57 = vrot.slane %v768_v44, %v709_v0 }
  0xe4   :  { %v539_v10 = vrot.slane %v770_v45, %v706_v63  ;;  %v375_v45 = vsel %vm374_vm8, %v373_v31, %v368_v13 }
  0xe6   :  { %v772_v46 = vpop.xlane.xlu1 %199 }
  0xe7   :  { %v774_v47 = vpop.xlane.xlu0 %183  ;;  %v430_v41 = vrot.slane %v772_v46, %v712_v3  ;;  %v505_v46 = vsel %vm374_vm8, %v504_v60, %v500_v7  ;;  %vm582_vm8 = vcmask 517120  }
  0xe8   :  { %v380_v42 = vrot.slane %v774_v47, %v379_v24 }
  0xea   :  { %v776_v48 = vpop.xlane.xlu1 %247 }
  0xeb   :  { %v778_v49 = vpop.xlane.xlu0 %231  ;;  %v548_v11 = vrot.slane %v776_v48, %v712_v3  ;;  %v414_v3 = vsub.s32 %v411_v56, %v700_v58  ;;  %v426_v48 = vsel %vm318_vm0, %v425_v39, %v421_v43 }
  0xec   :  { %v509_v12 = vrot.slane %v778_v49, %v379_v24  ;;  %v544_v49 = vsel %vm318_vm0, %v543_v57, %v539_v10  ;;  %vm590_vm0 = vcmask 1024  }
  0xed   :  { %v549_v16 = vsel %vm325_vm1, %v548_v11, %v544_v49  ;;  %v588_v11 = vstv %s952_s2 }
  0xee   :  { %v780_v50 = vpop.xlane.xlu1 %201  ;;  %v510_v17 = vsel %vm381_vm9, %v509_v12, %v505_v46 }
  0xef   :  { %v782_v51 = vpop.xlane.xlu0 %185  ;;  %v435_v0 = vrot.slane %v780_v50, %v724_v15  ;;  %v431_v50 = vsel %vm325_vm1, %v430_v41, %v426_v48 }
  0xf0   :  { %v387_v44 = vrot.slane %v782_v51, %v386_v28  ;;  %v382_v51 = vsel %vm381_vm9, %v380_v42, %v375_v45 }
  0xf1   :  { %v436_v58 = vsel %vm332_vm2, %v435_v0, %v431_v50 }
  0xf2   :  { %v784_v52 = vpop.xlane.xlu1 %249  ;;  %v389_v18 = vsel %vm388_vm10, %v387_v44, %v382_v51 }
  0xf3   :  { %v786_v53 = vpop.xlane.xlu0 %233  ;;  %v553_v63 = vrot.slane %v784_v52, %v724_v15 }
  0xf4   :  { %v514_v40 = vrot.slane %v786_v53, %v386_v28 }
  0xf5   :  { %v554_v27 = vsel %vm332_vm2, %v553_v63, %v549_v16 }
  0xf6   :  { %v788_v54 = vpop.xlane.xlu1 %203 }
  0xf7   :  { %v790_v55 = vpop.xlane.xlu0 %187  ;;  %v440_v15 = vrot.slane %v788_v54, %v732_v23  ;;  %v515_v54 = vsel %vm388_vm10, %v514_v40, %v510_v17 }
  0xf8   :  { %v394_v52 = vrot.slane %v790_v55, %v841_v29 }
  0xf9   :  { %v441_v28 = vsel %vm339_vm3, %v440_v15, %v436_v58 }
  0xfa   :  { %v795_v61 = vpop.xlane.xlu1 %251 }
  0xfb   :  { %v797_v62 = vpop.xlane.xlu0 %235  ;;  %v558_v53 = vrot.slane %v795_v61, %v732_v23 }
  0xfc   :  { %v519_v19 = vrot.slane %v797_v62, %v841_v29  ;;  %v396_v29 = vsel %vm395_vm11, %v394_v52, %v389_v18 }
  0xfe   :  { %v811_v8 = vpop.xlane.xlu1 %205 }
  0xff   :  { %v813_v9 = vpop.xlane.xlu0 %189  ;;  %v445_v20 = vrot.slane %v811_v8, %v801_v2 }
 0x100   :  { %v401_v21 = vrot.slane %v813_v9, %v848_v34 }
 0x101   :  { %v446_v33 = vsel %vm346_vm4, %v445_v20, %v441_v28 }
 0x102   :  { %v834_v25 = vpop.xlane.xlu1 %253 }
 0x103   :  { %v836_v26 = vpop.xlane.xlu0 %237  ;;  %v563_v55 = vrot.slane %v834_v25, %v801_v2  ;;  %v559_v25 = vsel %vm339_vm3, %v558_v53, %v554_v27 }
 0x104   :  { %v524_v23 = vrot.slane %v836_v26, %v848_v34  ;;  %v520_v26 = vsel %vm395_vm11, %v519_v19, %v515_v54  ;;  %v403_v34 = vsel %vm402_vm12, %v401_v21, %v396_v29 }
 0x106   :  { %v861_v1 = vpop.xlane.xlu1 %207 }
 0x107   :  { %v863_v5 = vpop.xlane.xlu0 %191  ;;  %v450_v61 = vrot.slane %v861_v1, %v804_v4 }
 0x108   :  { %v408_v62 = vrot.slane %v863_v5, %v851_v35 }
 0x109   :  { %v451_v59 = vsel %vm353_vm5, %v450_v61, %v446_v33 }
 0x10a   :  { %v256_v47 = vpop.xlane.xlu1 %255  ;;  %v410_v30 = vsel %vm409_vm13, %v408_v62, %v403_v34 }
 0x10b   :  { %v240_v14 = vpop.xlane.xlu0 %239  ;;  %v568_v8 = vrot.slane %v256_v47, %v804_v4  ;;  %v564_v4 = vsel %vm346_vm4, %v563_v55, %v559_v25 }
 0x10c   :  { %v529_v9 = vrot.slane %v240_v14, %v851_v35  ;;  %v525_v35 = vsel %vm402_vm12, %v524_v23, %v520_v26 }
 0x10d   :  { %v569_v31 = vsel %vm353_vm5, %v568_v8, %v564_v4 }
 0x10e   :  { %v210_v22 = vpop.xlane.xlu1 %209  ;;  %v530_v60 = vsel %vm409_vm13, %v529_v9, %v525_v35 }
 0x10f   :  { %v194_v24 = vpop.xlane.xlu0 %193  ;;  %v455_v32 = vrot.slane %v210_v22, %v808_v6 }
 0x110   :  { %v415_v2 = vrot.slane %v194_v24, %v414_v3 }
 0x111   :  { %v456_v1 = vsel %vm360_vm6, %v455_v32, %v451_v59 }
 0x112   :  { %v258_v36 = vpop.xlane.xlu1 %257  ;;  %v417_v5 = vsel %vm416_vm14, %v415_v2, %v410_v30 }
 0x113   :  { %v242_v37 = vpop.xlane.xlu0 %241  ;;  %v573_v38 = vrot.slane %v258_v36, %v808_v6 }
 0x114   :  { %v534_v56 = vrot.slane %v242_v37, %v414_v3 }
 0x115   :  { %v574_v7 = vsel %vm360_vm6, %v573_v38, %v569_v31 }
 0x116   :  { %v535_v39 = vsel %vm416_vm14, %v534_v56, %v530_v60  ;;  %v577_v6 = vsel %vm575_vm15, %v574_v7, %v456_v1 }
 0x117   :  { %v576_v57 = vsel %vm575_vm15, %v535_v39, %v417_v5  ;;  %v583_v41 = vsel %vm582_vm8, %v577_v6, 0.0 }
 0x118   :  { %v581_v10 = vsel %vm580_vm7, %v576_v57, 0.0 }
 0x119   :  { %v584_v42 = vadd.f32 %v583_v41, %v581_v10 }
 0x11b   :  { %585 = vadd.xlane.f32.xlu0 %v584_v42 }
 0x1a8   :  { %v586_v12 = vpop.xlane.xlu0 %585 }
 0x1a9   :  { %v589_v13 = vadd.f32 %v588_v11, %v586_v12 }
 0x1ab   :  { %591 = vst.msk [vmem:[%s953_s3] sm:$0x3] %vm590_vm0, %v589_v13 }
 0x1ac   :  { %596 = vsyncpa [#allocation4], 1 }
 0x1ad   :  { %597 = vsyncpa [#allocation6], 1 }

</bundles_post_ra>
